<compile_context>
chip_gen: v7x
topology: tpu7x:2x2x1
jax: 0.10.0
libtpu: 0.0.40
codegen_flags: <defaults>
</compile_context>

<pallas_src>
import functools
import math

import jax
import jax.numpy as jnp
from jax import lax
from jax.experimental import pallas as pl
from jax.experimental.pallas import tpu as pltpu


def _round_up(x, m):
    return ((x + m - 1) // m) * m


def _pick_row_chunk(tile_b):
    # Largest chunk <= 64 rows that evenly divides the tile (tile_b is a multiple of 8).
    for rc in (64, 32, 16, 8):
        if rc <= tile_b and tile_b % rc == 0:
            return rc
    return tile_b


def _pick_unroll(n_chunks, row_chunk):
    # Cap unrolling so at most ~128 rows of f32 temporaries are live at once
    # (keeps the per-chunk inp/sin/cos temps well inside the 64-vreg file).
    target = max(1, 128 // row_chunk)
    unroll = max(1, min(n_chunks, target))
    while n_chunks % unroll:
        unroll -= 1
    return unroll


def _detect_mode(freqs):
    """Pick the cheapest correct recurrence for the given frequency list."""
    n = len(freqs)
    if n <= 1:
        return "direct"
    f0 = freqs[0]
    # Geometric with ratio 2 (covers logscale 1,2,4,... and any f0*2^k chain).
    if f0 != 0.0 and all(
        abs(f - f0 * (2.0 ** k)) <= 1e-6 * abs(f0 * (2.0 ** k)) for k, f in enumerate(freqs)
    ):
        return "geometric"
    # Arithmetic progression (covers the linspace / non-logscale case).
    d = freqs[1] - freqs[0]
    if all(
        abs(f - (f0 + k * d)) <= 1e-6 * max(1.0, abs(f0 + k * d)) for k, f in enumerate(freqs)
    ):
        return "arithmetic"
    return "direct"


def _gauss_pos_embed_kernel(x_ref, bt_ref, out_ref, *, freqs, h_pad, row_chunk,
                            unroll, mode, reseed_every):
    # x_ref  : (TILE_B, in_channels)          VMEM
    # bt_ref : (in_channels, Hp)              VMEM  (B.T, lane-padded, broadcast across grid)
    # out_ref: (TILE_B, (2*Nf+1)*Hp)          VMEM  (lane-dense: every block 128-aligned)
    Hp = h_pad
    n_freqs = len(freqs)
    tile_b = x_ref.shape[0]
    n_chunks = tile_b // row_chunk

    bt = bt_ref[...]  # tiny (in_ch, Hp); load once, reused by every chunk

    def process_chunk(ci):
        if isinstance(ci, int):
            r0 = ci * row_chunk
        else:
            r0 = pl.multiple_of(ci * row_chunk, row_chunk)
        rows = pl.ds(r0, row_chunk)
        xc = x_ref[rows, :]                                          # (row_chunk, in_ch)
        # K = in_channels is tiny, but the MXU slot is otherwise idle -> effectively free.
        inp = jnp.dot(xc, bt, preferred_element_type=jnp.float32)    # (row_chunk, Hp)

        # Block 0: the raw projection passthrough.
        # NOTE: with out_dtype=bf16 this block is quantized too (documented tradeoff).
        out_ref[rows, 0:Hp] = inp.astype(out_ref.dtype)
        if n_freqs == 0:
            return

        base = jnp.float32(math.pi) * inp                            # pi * inp

        if mode == "arithmetic":
            # One extra sin/cos pair per chunk gives every subsequent frequency via
            # angle-addition FMAs (4 VALU FMAs / frequency instead of 2 transcendentals).
            d = freqs[1] - freqs[0]
            darg = jnp.float32(d) * base
            sd = jnp.sin(darg)
            cd = jnp.cos(darg)

        s = c = None
        for k in range(n_freqs):
            if mode == "direct" or (k % reseed_every) == 0 or s is None:
                # Direct (re)seed every `reseed_every` octaves bounds recurrence drift.
                th = jnp.float32(freqs[k]) * base
                s = jnp.sin(th)
                c = jnp.cos(th)
            lo = (1 + 2 * k) * Hp
            out_ref[rows, lo:lo + Hp] = s.astype(out_ref.dtype)
            out_ref[rows, lo + Hp:lo + 2 * Hp] = c.astype(out_ref.dtype)
            nxt = k + 1
            if nxt < n_freqs and mode != "direct" and (nxt % reseed_every) != 0:
                if mode == "geometric":
                    # freqs[k+1] = 2*freqs[k]:  sin(2a)=2sc, cos(2a)=1-2s^2  (VPU FMAs only)
                    s, c = 2.0 * s * c, 1.0 - 2.0 * s * s
                else:
                    # freqs[k+1] = freqs[k] + d:  angle-addition recurrence
                    s, c = s * cd + c * sd, c * cd - s * sd

    n_super = n_chunks // unroll
    if n_super <= 1:
        for ci in range(n_chunks):
            process_chunk(ci)
    else:
        def super_body(si, carry):
            for u in range(unroll):
                process_chunk(si * unroll + u)
            return carry
        # Outer loop bounds live ranges; inner Python `for` is the capped unroll.
        lax.fori_loop(0, n_super, super_body, 0)


def gauss_pos_embedding(x, B, freqs, *, out_dtype=jnp.float32, max_tile_b=None):
    """x: (Batch, in_channels) f32; B: (b_height, in_channels) f32; freqs: python floats.

    out_dtype=jnp.bfloat16 is the recommended high-throughput path on v5e/v6e
    (halves HBM writeback); the default f32 matches the PyTorch module exactly.
    """
    batch, in_channels = x.shape
    b_height, in_c2 = B.shape
    assert in_c2 == in_channels, (B.shape, x.shape)
    freqs = tuple(float(f) for f in freqs)
    n_freqs = len(freqs)
    n_blocks = 2 * n_freqs + 1
    out_cols = b_height * n_blocks

    # Lane padding: keep every per-frequency column store 128-aligned / unmasked.
    h_pad = _round_up(b_height, 128)
    out_cols_pad = h_pad * n_blocks

    mode = _detect_mode(freqs)
    out_itemsize = jnp.dtype(out_dtype).itemsize

    # ---- tile selection -------------------------------------------------------
    padded8 = _round_up(max(batch, 1), 8)
    # Budget for the double-buffered output tile. 9 MiB keeps output + lane-padded
    # x buffers inside the most restrictive default scoped VMEM (v5e: 16 MiB):
    # f32 @ 9*128 cols -> 1024-row tiles, bf16 -> 2048-row tiles.
    budget = 9 * 1024 * 1024
    tile_cap = max(8, (budget // (2 * out_cols_pad * out_itemsize)) // 8 * 8)
    if max_tile_b is not None:
        tile_cap = max(8, min(tile_cap, _round_up(int(max_tile_b), 8)))

    n_steps = max(1, pl.cdiv(padded8, tile_cap))
    # v7x megacore: want >= 2 and an even number of grid steps so both TensorCores
    # get balanced work (only when there is enough batch to split).
    if padded8 >= 16:
        n_steps = max(n_steps, 2)
    if n_steps > 1 and n_steps % 2 == 1:
        n_steps += 1
    tile_b = _round_up(pl.cdiv(padded8, n_steps), 8)   # bounds padding waste to <8*n_steps rows
    padded = tile_b * n_steps
    row_chunk = _pick_row_chunk(tile_b)
    n_chunks = tile_b // row_chunk
    unroll = _pick_unroll(n_chunks, row_chunk)

    if padded != batch:
        x = jnp.pad(x, ((0, padded - batch), (0, 0)))

    # For a static module parameter, precompute bt once outside the call path;
    # it is a tiny transpose so doing it here is also fine.
    bt = B.T                                            # (in_channels, b_height)
    if h_pad != b_height:
        bt = jnp.pad(bt, ((0, 0), (0, h_pad - b_height)))

    kernel = functools.partial(
        _gauss_pos_embed_kernel,
        freqs=freqs,
        h_pad=h_pad,
        row_chunk=row_chunk,
        unroll=unroll,
        mode=mode,
        reseed_every=4,
    )

    if mode == "direct":
        n_trans_per_elt = 2 * n_freqs
    elif mode == "geometric":
        n_trans_per_elt = 2 * pl.cdiv(max(n_freqs, 1), 4)
    else:
        n_trans_per_elt = 2 + 2 * pl.cdiv(max(n_freqs, 1), 4)
    cost = pl.CostEstimate(
        flops=int(2 * padded * in_channels * h_pad + 8 * padded * h_pad * max(n_freqs, 1)),
        transcendentals=int(padded * h_pad * n_trans_per_elt),
        bytes_accessed=int(
            4 * (padded * in_channels + in_channels * h_pad)
            + out_itemsize * padded * out_cols_pad
        ),
    )

    out = pl.pallas_call(
        kernel,
        out_shape=jax.ShapeDtypeStruct((padded, out_cols_pad), out_dtype),
        grid=(n_steps,),
        in_specs=[
            pl.BlockSpec((tile_b, in_channels), lambda i: (i, 0)),
            pl.BlockSpec((in_channels, h_pad), lambda i: (0, 0)),
        ],
        out_specs=pl.BlockSpec((tile_b, out_cols_pad), lambda i: (i, 0)),
        compiler_params=pltpu.CompilerParams(
            dimension_semantics=("parallel",),
            vmem_limit_bytes=32 * 1024 * 1024,
        ),
        cost_estimate=cost,
    )(x, bt)

    # Strip the lane padding (if any) and the batch padding.
    if h_pad != b_height:
        out = out.reshape(padded, n_blocks, h_pad)[:, :, :b_height].reshape(padded, out_cols)
    if padded != batch:
        out = out[:batch]
    return out


def gauss_pos_embedding_ref(x, B, freqs):
    """Pure-JAX reference mirroring the PyTorch forward."""
    inp = x @ B.T
    parts = [inp]
    for f in freqs:
        parts.append(jnp.sin(f * inp * jnp.pi))
        parts.append(jnp.cos(f * inp * jnp.pi))
    return jnp.concatenate(parts, axis=1)


if __name__ == "__main__":
    in_channels = 4
    N_freqs = 4
    b_scale = 1.0

    key = jax.random.PRNGKey(0)
    k_b, k_x, k_x2, k_b2, k_x3 = jax.random.split(key, 5)

    # --- Test 1: logscale freqs, b_height multiple of 128, f32 default path -----
    b_height = 128
    B = b_scale * jax.random.normal(k_b, (b_height, in_channels), dtype=jnp.float32)
    freqs_log = tuple(float(2.0 ** i) for i in range(N_freqs))
    out_cols = b_height * (2 * N_freqs + 1)

    batch = 8
    x = jax.random.normal(k_x, (batch, in_channels), dtype=jnp.float32)
    out = jax.block_until_ready(gauss_pos_embedding(x, B, freqs_log))
    ref = gauss_pos_embedding_ref(x, B, freqs_log)
    assert out.shape == (batch, out_cols), out.shape
    assert jnp.allclose(out, ref, atol=5e-4, rtol=1e-4), float(jnp.max(jnp.abs(out - ref)))

    # bf16 fast path (recommended on v5e/v6e; halves HBM writeback).
    out_bf = jax.block_until_ready(
        gauss_pos_embedding(x, B, freqs_log, out_dtype=jnp.bfloat16))
    assert out_bf.dtype == jnp.bfloat16
    assert jnp.allclose(out_bf.astype(jnp.float32), ref, atol=5e-2, rtol=2e-2), \
        float(jnp.max(jnp.abs(out_bf.astype(jnp.float32) - ref)))

    # --- Test 2: multi-grid-step + batch padding --------------------------------
    batch2 = 72
    x2 = jax.random.normal(k_x2, (batch2, in_channels), dtype=jnp.float32)
    out2 = jax.block_until_ready(gauss_pos_embedding(x2, B, freqs_log))
    ref2 = gauss_pos_embedding_ref(x2, B, freqs_log)
    assert out2.shape == (batch2, out_cols), out2.shape
    assert jnp.allclose(out2, ref2, atol=5e-4, rtol=1e-4), float(jnp.max(jnp.abs(out2 - ref2)))

    # --- Test 3: linspace (arithmetic) freqs + b_height not a multiple of 128 ---
    b_height2 = 96
    B2 = b_scale * jax.random.normal(k_b2, (b_height2, in_channels), dtype=jnp.float32)
    freqs_lin = tuple(float(v) for v in jnp.linspace(1.0, 2.0 ** (N_freqs - 1), N_freqs))
    batch3 = 37
    x3 = jax.random.normal(k_x3, (batch3, in_channels), dtype=jnp.float32)
    out3 = jax.block_until_ready(gauss_pos_embedding(x3, B2, freqs_lin))
    ref3 = gauss_pos_embedding_ref(x3, B2, freqs_lin)
    assert out3.shape == (batch3, b_height2 * (2 * N_freqs + 1)), out3.shape
    assert jnp.allclose(out3, ref3, atol=1e-3, rtol=1e-3), float(jnp.max(jnp.abs(out3 - ref3)))

    print("KERNEL_OK")
</pallas_src>

<mosaic_0001>
module attributes {stable_mosaic.version = 11 : i64} {
  func.func @_gauss_pos_embed_kernel(%arg0: i32, %arg1: memref<8x4xf32, #tpu.memory_space<vmem>>, %arg2: memref<4x128xf32, #tpu.memory_space<vmem>>, %arg3: memref<8x1152xf32, #tpu.memory_space<vmem>>) attributes {dimension_semantics = [#tpu.dimension_semantics<parallel>], iteration_bounds = array<i64: 1>, scalar_prefetch = 0 : i64, scratch_operands = 0 : i64, tpu.core_type = #tpu.core_type<tc>, window_params = [{transform_indices = @transform_0, window_bounds = array<i64: 8, 4>}, {pipeline_mode = #tpu.pipeline_mode<synchronous>, transform_indices = @transform_1, window_bounds = array<i64: 4, 128>}, {transform_indices = @transform_2, window_bounds = array<i64: 8, 1152>}]} {
    %c0 = arith.constant 0 : index
    %c0_0 = arith.constant 0 : index
    %0 = vector.load %arg2[%c0, %c0_0] : memref<4x128xf32, #tpu.memory_space<vmem>>, vector<4x128xf32>
    %c0_1 = arith.constant 0 : index
    %c0_2 = arith.constant 0 : index
    %1 = vector.load %arg1[%c0_1, %c0_2] : memref<8x4xf32, #tpu.memory_space<vmem>>, vector<8x4xf32>
    %cst = arith.constant dense<0.000000e+00> : vector<8x128xf32>
    %2 = tpu.matmul %1, %0, %cst {dimension_numbers = #tpu.dot_dimension_numbers<[1], [0], [0], [1], [0, 0, 1, 1], [], []>} : vector<8x4xf32>, vector<4x128xf32>, vector<8x128xf32> -> vector<8x128xf32>
    %c0_3 = arith.constant 0 : index
    %c0_4 = arith.constant 0 : index
    %3 = vector.load %arg3[%c0_3, %c0_4] : memref<8x1152xf32, #tpu.memory_space<vmem>>, vector<8x128xf32>
    tpu.vector_store %arg3[%c0_3, %c0_4], %2 {strides = array<i32>} : memref<8x1152xf32, #tpu.memory_space<vmem>>, vector<8x128xf32>,
    %cst_5 = arith.constant 3.14159274 : f32
    %4 = vector.broadcast %cst_5 : f32 to vector<8x128xf32>
    %5 = arith.mulf %4, %2 : vector<8x128xf32>
    %cst_6 = arith.constant 1.000000e+00 : f32
    %6 = vector.broadcast %cst_6 : f32 to vector<8x128xf32>
    %7 = arith.mulf %6, %5 : vector<8x128xf32>
    %8 = math.sin %7 : vector<8x128xf32>
    %9 = math.cos %7 : vector<8x128xf32>
    %c0_7 = arith.constant 0 : index
    %c128 = arith.constant 128 : index
    %10 = vector.load %arg3[%c0_7, %c128] : memref<8x1152xf32, #tpu.memory_space<vmem>>, vector<8x128xf32>
    tpu.vector_store %arg3[%c0_7, %c128], %8 {strides = array<i32>} : memref<8x1152xf32, #tpu.memory_space<vmem>>, vector<8x128xf32>,
    %c0_8 = arith.constant 0 : index
    %c256 = arith.constant 256 : index
    %11 = vector.load %arg3[%c0_8, %c256] : memref<8x1152xf32, #tpu.memory_space<vmem>>, vector<8x128xf32>
    tpu.vector_store %arg3[%c0_8, %c256], %9 {strides = array<i32>} : memref<8x1152xf32, #tpu.memory_space<vmem>>, vector<8x128xf32>,
    %cst_9 = arith.constant 2.000000e+00 : f32
    %12 = vector.broadcast %cst_9 : f32 to vector<8x128xf32>
    %13 = arith.mulf %12, %8 : vector<8x128xf32>
    %14 = arith.mulf %13, %9 : vector<8x128xf32>
    %cst_10 = arith.constant 2.000000e+00 : f32
    %15 = vector.broadcast %cst_10 : f32 to vector<8x128xf32>
    %16 = arith.mulf %15, %8 : vector<8x128xf32>
    %17 = arith.mulf %16, %8 : vector<8x128xf32>
    %cst_11 = arith.constant 1.000000e+00 : f32
    %18 = vector.broadcast %cst_11 : f32 to vector<8x128xf32>
    %19 = arith.subf %18, %17 : vector<8x128xf32>
    %c0_12 = arith.constant 0 : index
    %c384 = arith.constant 384 : index
    %20 = vector.load %arg3[%c0_12, %c384] : memref<8x1152xf32, #tpu.memory_space<vmem>>, vector<8x128xf32>
    tpu.vector_store %arg3[%c0_12, %c384], %14 {strides = array<i32>} : memref<8x1152xf32, #tpu.memory_space<vmem>>, vector<8x128xf32>,
    %c0_13 = arith.constant 0 : index
    %c512 = arith.constant 512 : index
    %21 = vector.load %arg3[%c0_13, %c512] : memref<8x1152xf32, #tpu.memory_space<vmem>>, vector<8x128xf32>
    tpu.vector_store %arg3[%c0_13, %c512], %19 {strides = array<i32>} : memref<8x1152xf32, #tpu.memory_space<vmem>>, vector<8x128xf32>,
    %cst_14 = arith.constant 2.000000e+00 : f32
    %22 = vector.broadcast %cst_14 : f32 to vector<8x128xf32>
    %23 = arith.mulf %22, %14 : vector<8x128xf32>
    %24 = arith.mulf %23, %19 : vector<8x128xf32>
    %cst_15 = arith.constant 2.000000e+00 : f32
    %25 = vector.broadcast %cst_15 : f32 to vector<8x128xf32>
    %26 = arith.mulf %25, %14 : vector<8x128xf32>
    %27 = arith.mulf %26, %14 : vector<8x128xf32>
    %cst_16 = arith.constant 1.000000e+00 : f32
    %28 = vector.broadcast %cst_16 : f32 to vector<8x128xf32>
    %29 = arith.subf %28, %27 : vector<8x128xf32>
    %c0_17 = arith.constant 0 : index
    %c640 = arith.constant 640 : index
    %30 = vector.load %arg3[%c0_17, %c640] : memref<8x1152xf32, #tpu.memory_space<vmem>>, vector<8x128xf32>
    tpu.vector_store %arg3[%c0_17, %c640], %24 {strides = array<i32>} : memref<8x1152xf32, #tpu.memory_space<vmem>>, vector<8x128xf32>,
    %c0_18 = arith.constant 0 : index
    %c768 = arith.constant 768 : index
    %31 = vector.load %arg3[%c0_18, %c768] : memref<8x1152xf32, #tpu.memory_space<vmem>>, vector<8x128xf32>
    tpu.vector_store %arg3[%c0_18, %c768], %29 {strides = array<i32>} : memref<8x1152xf32, #tpu.memory_space<vmem>>, vector<8x128xf32>,
    %cst_19 = arith.constant 2.000000e+00 : f32
    %32 = vector.broadcast %cst_19 : f32 to vector<8x128xf32>
    %33 = arith.mulf %32, %24 : vector<8x128xf32>
    %34 = arith.mulf %33, %29 : vector<8x128xf32>
    %cst_20 = arith.constant 2.000000e+00 : f32
    %35 = vector.broadcast %cst_20 : f32 to vector<8x128xf32>
    %36 = arith.mulf %35, %24 : vector<8x128xf32>
    %37 = arith.mulf %36, %24 : vector<8x128xf32>
    %cst_21 = arith.constant 1.000000e+00 : f32
    %38 = vector.broadcast %cst_21 : f32 to vector<8x128xf32>
    %39 = arith.subf %38, %37 : vector<8x128xf32>
    %c0_22 = arith.constant 0 : index
    %c896 = arith.constant 896 : index
    %40 = vector.load %arg3[%c0_22, %c896] : memref<8x1152xf32, #tpu.memory_space<vmem>>, vector<8x128xf32>
    tpu.vector_store %arg3[%c0_22, %c896], %34 {strides = array<i32>} : memref<8x1152xf32, #tpu.memory_space<vmem>>, vector<8x128xf32>,
    %c0_23 = arith.constant 0 : index
    %c1024 = arith.constant 1024 : index
    %41 = vector.load %arg3[%c0_23, %c1024] : memref<8x1152xf32, #tpu.memory_space<vmem>>, vector<8x128xf32>
    tpu.vector_store %arg3[%c0_23, %c1024], %39 {strides = array<i32>} : memref<8x1152xf32, #tpu.memory_space<vmem>>, vector<8x128xf32>,
    return
  }
  func.func @transform_0(%arg0: i32) -> (i32, i32) {
    %c0_i32 = arith.constant 0 : i32
    %c0_i32_0 = arith.constant 0 : i32
    return %arg0, %c0_i32 : i32, i32
  }
  func.func @transform_1(%arg0: i32) -> (i32, i32) {
    %c0_i32 = arith.constant 0 : i32
    %c0_i32_0 = arith.constant 0 : i32
    %c0_i32_1 = arith.constant 0 : i32
    return %c0_i32, %c0_i32_0 : i32, i32
  }
  func.func @transform_2(%arg0: i32) -> (i32, i32) {
    %c0_i32 = arith.constant 0 : i32
    %c0_i32_0 = arith.constant 0 : i32
    return %arg0, %c0_i32 : i32, i32
  }
}

</mosaic_0001>

<bundles_post_ra>
// kernel: tpu_custom_call.1
= control target key start
LH: loop header
LB: loop body
LE: loop exit
PB: predicated region body
PF: predicated region fallthrough
CT: control target
= control target key end

     0   :  { %vm18_vm0 = vcmask 1043456   ;;  %v393_v2 = vmov 0.0   ;;  %vm394_vm1 = vmmov 0   ;;  %vm14_vm2 = vcmask 31744   ;;  %s456_s0 = inlined_call_operand.vmem [shape: f32[8,4], index: 0, kind: input, shape index: {}]   ;;  %s457_s1 = inlined_call_operand.vmem [shape: f32[4,128], index: 1, kind: input, shape index: {}]   ;;  %s458_s2 = inlined_call_operand.hbm [shape: f32[8,1152], index: 2, kind: output, shape index: {}]  }
   0x1   :  { %v12_v0 = vld [vmem:[%s457_s1] sm:$0xf]  ;;  %347 = vmatprep.subr.mxu0 %v393_v2  ;;  %349 = vmatprep.mubr.msk.f32.mxu0 %vm394_vm1, %v393_v2 }
   0x2   :  { %v13_v1 = vld [vmem:[%s456_s0] sm:$0xff] }
   0x3   :  { %7 = vsyncpa [#allocation3], 0  ;;  %348 = vmatpush3.msk.msra.mxu0 %vm18_vm0, %v12_v0  ;;  %v395_v16 = vmov 683565275   ;;  %v396_v18 = vmov 2475754826  }
   0x4   :  { %350 = vmatmul.mubr.msk.f32.vlgmr.msra.gmra.mrb[0].mxu0 %vm14_vm2, %v13_v1  ;;  %v397_v21 = vmov 2131351028   ;;  %v398_v24 = vmov 2102212464   ;;  %v399_v27 = vmov 920167782  }
   0x5   :  { %v400_v30 = vmov 1326507024   ;;  %s401_s0 = smov [#allocation2]  }
   0x6   :  { %s327_s1 = sshll.u32 %s401_s0, 4  ;;  %s328_s1 = int_to_ptr.vmem [resolvable:$true] %s327_s1 }
   0x7   :  { %s369_s13 = scalar_lea.vmem %s328_s1, 1152  ;;  %p374_p1 = scmp.lt.s32.totalorder %s328_s1, %s328_s1 }
   0x8   :  { %p370_p0 = scmp.ne.s32.totalorder %s328_s1, %s369_s13  ;;  %p375_p2 = scmp.lt.s32.totalorder %s369_s13, %s369_s13 }
   0xa   :  { %p376_p3 = por %p375_p2, %p374_p1 }
   0xc   :  { %p377_p4 = pnand %p376_p3, %p370_p0 }
  0xd7   :  { %v88_v3 = vpop.f32.mrb[0].mxu0 }
  0xd8   :  { %92 = vst [vmem:[#allocation2] sm:$0xff] %v88_v3  ;;  %v423_v4 = vmul.f32 3.1415927, %v88_v3  ;;  %v351_v5 = vpop.f32.mrb[1].mxu0 }
  0xda   :  { %v97_v6 = vand.u32 2139095040, %v423_v4  ;;  %v94_v10 = vand.u32 2147483647, %v423_v4  ;;  %vm96_vm10 = vcmp.lt.s32.totalorder %v423_v4, 0  ;;  %vm186_vm2 = vweird.f32 %v423_v4 }
  0xdc   :  { %v98_v7 = vshrl.u32 %v97_v6, 23  ;;  %v101_v13 = vand.u32 8388607, %v94_v10  ;;  %vm95_vm11 = vcmp.le.f32.partialorder %v94_v10, 0.7853982 }
  0xde   :  { %v337_v8 = vadd.s32 4294967169, %v98_v7  ;;  %v102_v32 = vor.u32 8388608, %v101_v13 }
  0xe0   :  { %v104_v9 = vadd.s32 1, %v337_v8  ;;  %v142_v46 = vshll.u32 %v102_v32, 8 }
  0xe2   :  { %vm105_vm3 = vcmp.gt.s32.totalorder %v104_v9, 0 }
  0xe3   :  { %v106_v11 = vsel %vm105_vm3, %v104_v9, 0 }
  0xe4   :  { %v108_v12 = vand.u32 31, %v106_v11  ;;  %v107_v15 = vshrl.u32 %v106_v11, 5 }
  0xe6   :  { %v109_v14 = vsub.s32 32, %v108_v12  ;;  %v111_v17 = vshll.u32 %v395_v16, %v108_v12  ;;  %v114_v19 = vshll.u32 %v396_v18, %v108_v12  ;;  %v117_v23 = vshll.u32 %v397_v21, %v108_v12 }
  0xe7   :  { %v120_v26 = vshll.u32 %v398_v24, %v108_v12  ;;  %v123_v29 = vshll.u32 %v399_v27, %v108_v12  ;;  %vm126_vm4 = vcmp.lt.s32.totalorder %v107_v15, 1  ;;  %vm129_vm5 = vcmp.lt.s32.totalorder %v107_v15, 4 }
  0xe8   :  { %v112_v20 = vshrl.u32 %v396_v18, %v109_v14  ;;  %v115_v22 = vshrl.u32 %v397_v21, %v109_v14  ;;  %v118_v25 = vshrl.u32 %v398_v24, %v109_v14  ;;  %v121_v28 = vshrl.u32 %v399_v27, %v109_v14 }
  0xe9   :  { %v124_v31 = vshrl.u32 %v400_v30, %v109_v14  ;;  %v110_v41 = vshrl.u32 %v395_v16, %v109_v14  ;;  %vm128_vm6 = vcmp.lt.s32.totalorder %v107_v15, 3  ;;  %vm127_vm7 = vcmp.lt.s32.totalorder %v107_v15, 2 }
  0xea   :  { %v113_v33 = vor.u32 %v112_v20, %v111_v17  ;;  %v116_v34 = vor.u32 %v115_v22, %v114_v19  ;;  %v119_v35 = vor.u32 %v118_v25, %v117_v23  ;;  %v122_v36 = vor.u32 %v121_v28, %v120_v26 }
  0xeb   :  { %v125_v37 = vor.u32 %v124_v31, %v123_v29 }
  0xec   :  { %v131_v38 = vsel %vm129_vm5, %v119_v35, 2102212464  ;;  %v134_v39 = vsel %vm126_vm4, %v113_v33, %v116_v34  ;;  %v138_v40 = vsel %vm126_vm4, %v116_v34, %v119_v35  ;;  %v135_v42 = vsel %vm129_vm5, %v122_v36, 920167782 }
  0xed   :  { %v139_v43 = vsel %vm129_vm5, %v125_v37, 1326507024  ;;  %v136_v44 = vsel %vm128_vm6, %v119_v35, %v135_v42  ;;  %v130_v47 = vsel %vm126_vm4, %v110_v41, %v113_v33  ;;  %v132_v48 = vsel %vm128_vm6, %v116_v34, %v131_v38 }
  0xee   :  { %v140_v45 = vsel %vm128_vm6, %v122_v36, %v139_v43  ;;  %v137_v49 = vsel %vm127_vm7, %v134_v39, %v136_v44  ;;  %v133_v55 = vsel %vm127_vm7, %v130_v47, %v132_v48 }
  0xef   :  { %v141_v50 = vsel %vm127_vm7, %v138_v40, %v140_v45  ;;  %v432_v53 = vmul.u32.u64.low %v142_v46, %v137_v49  ;;  %v433_v54 = vmul.u32.u64.high %v142_v46, %v137_v49, %v432_v53  ;;  %v149_v57 = vmul.u32 %v142_v46, %v133_v55 }
  0xf0   :  { %v429_v51 = vmul.u32.u64.low %v142_v46, %v141_v50  ;;  %v430_v52 = vmul.u32.u64.high %v142_v46, %v141_v50, %v429_v51 }
  0xf1   :  { %v152_v56 = vadd.s32 1, %v433_v54 }
  0xf2   :  { %vm151_vm8 = vc.u32 %v430_v52, %v432_v53  ;;  %v150_v6 = vadd.s32 %v432_v53, %v430_v52 }
  0xf3   :  { %v153_v58 = vsel %vm151_vm8, %v152_v56, %v433_v54 }
  0xf4   :  { %v154_v59 = vadd.s32 %v153_v58, %v149_v57 }
  0xf6   :  { %v155_v60 = vadd.s32 536870912, %v154_v59 }
  0xf8   :  { %v156_v61 = vshrl.u32 %v155_v60, 30 }
  0xfa   :  { %v157_v62 = vshll.u32 %v156_v61, 30  ;;  %v180_v19 = vsub.s32 4, %v156_v61 }
  0xfc   :  { %v158_v63 = vsub.s32 %v154_v59, %v157_v62  ;;  %v181_v22 = vsel %vm96_vm10, %v180_v19, %v156_v61 }
  0xfd   :  { %v183_v24 = vsel %vm95_vm11, 0, %v181_v22 }
  0xfe   :  { %v160_v0 = vsub.s32 0, %v158_v63  ;;  %v187_v25 = vadd.s32 3, %v183_v24  ;;  %v291_v27 = vand.u32 3, %v183_v24 }
 0x100   :  { %v338_v1 = vmin.u32 %v160_v0, %v158_v63  ;;  %v188_v26 = vand.u32 3, %v187_v25  ;;  %vm296_vm13 = vcmp.eq.s32.totalorder %v291_v27, 2  ;;  %vm293_vm15 = vcmp.eq.s32.totalorder %v291_v27, 0 }
 0x101   :  { %vm292_vm1 = vcmp.lt.s32.totalorder %v291_v27, 2 }
 0x102   :  { %v162_v2 = vclz %v338_v1  ;;  %vm193_vm12 = vcmp.eq.s32.totalorder %v188_v26, 2  ;;  %vm190_vm14 = vcmp.eq.s32.totalorder %v188_v26, 0  ;;  %vm189_vm0 = vcmp.lt.s32.totalorder %v188_v26, 2 }
 0x104   :  { %v339_v3 = vadd.s32 4294967294, %v162_v2 }
 0x106   :  { %vm340_vm9 = vcmp.lt.s32.totalorder %v339_v3, 0 }
 0x107   :  { %v165_v5 = vsel %vm340_vm9, 0, %v339_v3 }
 0x108   :  { %v166_v7 = vsub.s32 32, %v165_v5  ;;  %v170_v8 = vsub.s32 4294967266, %v165_v5  ;;  %v167_v9 = vshll.u32 %v158_v63, %v165_v5 }
 0x10a   :  { %v168_v11 = vshrl.u32 %v150_v6, %v166_v7  ;;  %v171_v12 = vadd.s32 127, %v170_v8 }
 0x10c   :  { %v169_v13 = vor.u32 %v168_v11, %v167_v9  ;;  %v172_v14 = vshll.u32 %v171_v12, 23 }
 0x10e   :  { %v173_v15 = vor.u32 4788187, %v172_v14  ;;  %v176_v17 = vcvt.s32.f32 %v169_v13 }
 0x110   :  { %v174_v16 = vand.u32 2147483647, %v173_v15 }
 0x112   :  { %v177_v18 = vmul.f32 %v176_v17, %v174_v16 }
 0x114   :  { %v178_v20 = vxor.u32 2147483648, %v177_v18 }
 0x116   :  { %v179_v21 = vsel %vm96_vm10, %v178_v20, %v177_v18 }
 0x117   :  { %v182_v23 = vsel %vm95_vm11, %v423_v4, %v179_v21 }
 0x118   :  { %365 = vcosq.f32 %v182_v23 }
 0x119   :  { %367 = vsinq.f32 %v182_v23 }
 0x122   :  { %v366_v28 = vpop.eup %365 }
 0x123   :  { %v368_v29 = vpop.eup %367  ;;  %v194_v30 = vxor.u32 2147483648, %v366_v28 }
 0x124   :  { %v191_v31 = vxor.u32 2147483648, %v368_v29 }
 0x125   :  { %v195_v32 = vsel %vm193_vm12, %v194_v30, %v368_v29  ;;  %v298_v10 = vsel %vm296_vm13, %v194_v30, %v368_v29 }
 0x126   :  { %v192_v33 = vsel %vm190_vm14, %v366_v28, %v191_v31  ;;  %v295_v34 = vsel %vm293_vm15, %v366_v28, %v191_v31 }
 0x127   :  { %v196_v35 = vsel %vm189_vm0, %v192_v33, %v195_v32  ;;  %v299_v36 = vsel %vm292_vm1, %v295_v34, %v298_v10 }
 0x128   :  { %v197_v37 = vsel %vm186_vm2, nan, %v196_v35  ;;  %v300_v38 = vsel %vm186_vm2, nan, %v299_v36 }
 0x129   :  { %301 = vst [vmem:[#allocation2 + $0x8] sm:$0xff] %v197_v37  ;;  %302 = vst [vmem:[#allocation2 + $0x10] sm:$0xff] %v300_v38  ;;  %v303_v39 = vmul.f32 2.0, %v197_v37 }
 0x12b   :  { %v304_v40 = vmul.f32 %v303_v39, %v300_v38  ;;  %v305_v41 = vmul.f32 %v303_v39, %v197_v37 }
 0x12d   :  { %v306_v42 = vsub.f32 1.0, %v305_v41  ;;  %307 = vst [vmem:[#allocation2 + $0x18] sm:$0xff] %v304_v40  ;;  %v309_v43 = vmul.f32 2.0, %v304_v40 }
 0x12f   :  { %308 = vst [vmem:[#allocation2 + $0x20] sm:$0xff] %v306_v42  ;;  %v310_v44 = vmul.f32 %v309_v43, %v306_v42  ;;  %v311_v45 = vmul.f32 %v309_v43, %v304_v40 }
 0x131   :  { %v312_v46 = vsub.f32 1.0, %v311_v45  ;;  %313 = vst [vmem:[#allocation2 + $0x28] sm:$0xff] %v310_v44  ;;  %v315_v47 = vmul.f32 2.0, %v310_v44 }
 0x133   :  { %314 = vst [vmem:[#allocation2 + $0x30] sm:$0xff] %v312_v46  ;;  %v316_v4 = vmul.f32 %v315_v47, %v312_v46  ;;  %v317_v48 = vmul.f32 %v315_v47, %v310_v44 }
 0x135   :  { %v318_v49 = vsub.f32 1.0, %v317_v48  ;;  %319 = vst [vmem:[#allocation2 + $0x38] sm:$0xff] %v316_v4 }
 0x137   :  { %320 = vst [vmem:[#allocation2 + $0x40] sm:$0xff] %v318_v49 }
 0x138   :  { %380 = shalt.err (!%p377_p4)
}
 0x139   :  { %s381_s16 = scalar_lea.hbm %s458_s2, 1152 }
 0x13a   :  { %p382_p5 = scmp.ne.s32.totalorder %s458_s2, %s381_s16  ;;  %p385_p6 = scmp.lt.u32.totalorder %s381_s16, %s458_s2 }
 0x13c   :  { %p387_p7 = pnand %p385_p6, %p382_p5 }
 0x13e   :  { %390 = shalt.err (!%p387_p7)
}
 0x13f   :  { %330 = dma.vmem_to_hbm [thread:$0]  %s328_s1, 1152, %s458_s2, [#allocation3]  }
 0x140   :  { %391 = dma.done.wait [#allocation3], 1152  }
 0x141   :  { %392 = vsyncadd [#allocation3], 4294966144 }
 0x142   :  { %334 = vsyncpa [#allocation3], 1 }

</bundles_post_ra>
